<compile_context>
chip_gen: v6e
topology: v6e:2x2x1
jax: 0.10.0
libtpu: 0.0.40
codegen_flags: <defaults>
</compile_context>

<pallas_src>
import math
from functools import partial

import jax
import jax.numpy as jnp
from jax.experimental import pallas as pl
from jax.experimental.pallas import tpu as pltpu

F32 = jnp.float32
BF16 = jnp.bfloat16
MASK = -1e30      # additive bias for non-edges / padding
M_INIT = -1e20    # online-softmax running-max init (>> MASK, << any real |score|)


def _round_up(x, m):
    return ((x + m - 1) // m) * m


def _dst_tiling(n_dst, cap=128):
    # cap=128: >=2 dst tiles for n_dst >= 256 (both v7x TensorCores get work) and a
    # bounded [tile_d, src_block] score block for v7x's 64 MiB VMEM.
    tile = min(cap, _round_up(max(n_dst, 1), 8))
    return tile, _round_up(n_dst, tile)


def _src_tiling(max_ns, blk_cap=512):
    # +1 reserves the always-valid "sink" column (v = 0) that absorbs dst rows with no
    # in-edges of an edge type, so no per-row validity mask / multiply is needed.
    need = max_ns + 1
    blk = min(blk_cap, _round_up(need, 128))
    return blk, _round_up(need, blk)


# --------------------------------------------------------------------------- #
# Kernel 1: per-edge-type folded K/V projection (computed once, bf16 to HBM)   #
# --------------------------------------------------------------------------- #
def _kv_proj_kernel(x_ref, wk_ref, bk_ref, wv_ref, bv_ref, k_ref, v_ref, *,
                    n_valid, blk):
    pid = pl.program_id(0)
    x = x_ref[...]                                              # bf16 [blk, in_ch]
    k = jnp.dot(x, wk_ref[...], preferred_element_type=F32) + bk_ref[...]
    v = jnp.dot(x, wv_ref[...], preferred_element_type=F32) + bv_ref[...]
    rows = jax.lax.broadcasted_iota(jnp.int32, k.shape, 0) + pid * blk
    keep = rows < n_valid                                       # zero padded rows (incl. sink)
    k_ref[...] = jnp.where(keep, k, 0.0).astype(k_ref.dtype)
    v_ref[...] = jnp.where(keep, v, 0.0).astype(v_ref.dtype)


def kv_project(x_src, wkf, bkf, wvf, bvf, *, ns_pad, src_block):
    n_src, in_ch = x_src.shape
    out_ch = wkf.shape[1]
    x_pad = jnp.zeros((ns_pad, in_ch), BF16).at[:n_src].set(x_src.astype(BF16))
    kernel = partial(_kv_proj_kernel, n_valid=n_src, blk=src_block)
    return pl.pallas_call(
        kernel,
        out_shape=(jax.ShapeDtypeStruct((ns_pad, out_ch), BF16),
                   jax.ShapeDtypeStruct((ns_pad, out_ch), BF16)),
        grid=(ns_pad // src_block,),
        in_specs=[pl.BlockSpec((src_block, in_ch), lambda i: (i, 0)),
                  pl.BlockSpec((in_ch, out_ch), lambda i: (0, 0)),
                  pl.BlockSpec((1, out_ch), lambda i: (0, 0)),
                  pl.BlockSpec((in_ch, out_ch), lambda i: (0, 0)),
                  pl.BlockSpec((1, out_ch), lambda i: (0, 0))],
        out_specs=(pl.BlockSpec((src_block, out_ch), lambda i: (i, 0)),
                   pl.BlockSpec((src_block, out_ch), lambda i: (i, 0))),
        compiler_params=pltpu.CompilerParams(
            dimension_semantics=("parallel",),
            vmem_limit_bytes=32 * 1024 * 1024),
    )(x_pad, wkf.astype(BF16), bkf.reshape(1, -1).astype(F32),
      wvf.astype(BF16), bvf.reshape(1, -1).astype(F32))


# --------------------------------------------------------------------------- #
# Kernel 2: fused per-dst-type attention (flash-style over src blocks)         #
#           + sum over edge types + GELU + a_lin + gated skip + ReLU           #
# --------------------------------------------------------------------------- #
def _hgt_attn_kernel(*refs, n_edges, heads, head_dim, use_skip, apply_relu):
    """Inputs: x_dst, wq, bq, wlin, blin, alpha(SMEM), then per edge type (K, V, bias).
    Output: out tile.  Scratch: q (bf16), then per edge type (m, l, acc)."""
    n_in = 6 + 3 * n_edges
    x_dst_ref, wq_ref, bq_ref, wlin_ref, blin_ref, alpha_ref = refs[:6]
    out_ref = refs[n_in]
    q_sc = refs[n_in + 1]

    def edge_refs(e):
        k_ref, v_ref, b_ref = refs[6 + 3 * e: 9 + 3 * e]
        m_sc, l_sc, acc_sc = refs[n_in + 2 + 3 * e: n_in + 5 + 3 * e]
        return k_ref, v_ref, b_ref, m_sc, l_sc, acc_sc

    j = pl.program_id(1)
    last_j = pl.num_programs(1) - 1

    @pl.when(j == 0)
    def _init():
        # Q projection computed once per dst tile (not per src block).
        q = jnp.dot(x_dst_ref[...].astype(BF16), wq_ref[...],
                    preferred_element_type=F32) + bq_ref[...]
        q_sc[...] = q.astype(BF16)
        for e in range(n_edges):
            _, _, _, m_sc, l_sc, acc_sc = edge_refs(e)
            m_sc[...] = jnp.full(m_sc.shape, M_INIT, F32)
            l_sc[...] = jnp.zeros(l_sc.shape, F32)
            acc_sc[...] = jnp.zeros(acc_sc.shape, F32)

    q_full = q_sc[...]                                          # bf16 [tile_d, out_ch]
    for e in range(n_edges):                                    # static unroll
        k_ref, v_ref, b_ref, m_sc, l_sc, acc_sc = edge_refs(e)
        k = k_ref[...]                                          # bf16 [blk, out_ch]
        v = v_ref[...]
        bias = b_ref[...].astype(F32)                           # [tile_d, blk]
        for h in range(heads):                                  # 128-lane aligned slices
            lo = h * head_dim
            sl = slice(lo, lo + head_dim)
            # scores: contract head dims directly on the MXU (no transpose)
            s = jax.lax.dot_general(q_full[:, sl], k[:, sl],
                                    dimension_numbers=(((1,), (1,)), ((), ())),
                                    preferred_element_type=F32) + bias
            m_old = m_sc[h]                                     # [tile_d, 1]
            m_new = jnp.maximum(m_old, jnp.max(s, axis=-1, keepdims=True))
            corr = jnp.exp(m_old - m_new)
            p = jnp.exp(s - m_new)                              # masked cols underflow to 0
            l_sc[h] = corr * l_sc[h] + jnp.sum(p, axis=-1, keepdims=True)
            pv = jnp.dot(p.astype(BF16), v[:, sl], preferred_element_type=F32)
            acc_sc[:, sl] = corr * acc_sc[:, sl] + pv
            m_sc[h] = m_new

    @pl.when(j == last_j)
    def _finalize():
        # Normalize per (edge type, head), sum over edge types into edge-0's accumulator
        # (128-aligned slices), then a SINGLE GELU + full-K a_lin matmul.
        acc0 = edge_refs(0)[5]
        for h in range(heads):
            sl = slice(h * head_dim, (h + 1) * head_dim)
            total = None
            for e in range(n_edges):
                _, _, _, _, l_sc, acc_sc = edge_refs(e)
                part = acc_sc[:, sl] * (1.0 / l_sc[h])          # l >= 1 always (sink col)
                total = part if total is None else total + part
            acc0[:, sl] = total
        agg = acc0[...]
        g = 0.5 * agg * (1.0 + jax.lax.erf(agg * (1.0 / math.sqrt(2.0))))  # exact GELU
        out = jnp.dot(g.astype(BF16), wlin_ref[...],
                      preferred_element_type=F32) + blin_ref[...]
        if use_skip:                                            # gated residual
            a = alpha_ref[0]
            out = a * out + (1.0 - a) * x_dst_ref[...]
        if apply_relu:
            out = jnp.maximum(out, 0.0)
        out_ref[...] = out.astype(out_ref.dtype)


def hgt_dst_attention(x_dst, wq, bq, wlin, blin, alpha, edge_kvb, *,
                      heads, head_dim, use_skip, apply_relu,
                      tile_d, n_pad, src_block, ns_pad):
    n_dst, in_ch = x_dst.shape
    out_ch = wq.shape[1]
    n_edges = len(edge_kvb)
    assert out_ch == heads * head_dim and head_dim % 128 == 0, \
        "head_dim must be a multiple of 128 for lane-aligned per-head slices"

    x_pad = jnp.zeros((n_pad, in_ch), F32).at[:n_dst].set(x_dst.astype(F32))
    grid = (n_pad // tile_d, ns_pad // src_block)

    in_specs = [
        pl.BlockSpec((tile_d, in_ch), lambda i, j: (i, 0)),     # x_dst
        pl.BlockSpec((in_ch, out_ch), lambda i, j: (0, 0)),     # wq
        pl.BlockSpec((1, out_ch), lambda i, j: (0, 0)),         # bq
        pl.BlockSpec((out_ch, out_ch), lambda i, j: (0, 0)),    # wlin
        pl.BlockSpec((1, out_ch), lambda i, j: (0, 0)),         # blin
        pl.BlockSpec(memory_space=pltpu.MemorySpace.SMEM),      # alpha scalar
    ]
    args = [x_pad, wq.astype(BF16), bq.reshape(1, -1).astype(F32),
            wlin.astype(BF16), blin.reshape(1, -1).astype(F32),
            alpha.reshape(1).astype(F32)]

    for (k_e, v_e, bias_e) in edge_kvb:
        in_specs += [
            pl.BlockSpec((src_block, out_ch), lambda i, j: (j, 0)),   # K block (bf16)
            pl.BlockSpec((src_block, out_ch), lambda i, j: (j, 0)),   # V block (bf16)
            pl.BlockSpec((tile_d, src_block), lambda i, j: (i, j)),   # additive bias block
        ]
        args += [k_e, v_e, bias_e]

    scratch = [pltpu.VMEM((tile_d, out_ch), BF16)]              # q
    for _ in range(n_edges):
        scratch += [pltpu.VMEM((heads, tile_d, 1), F32),        # m
                    pltpu.VMEM((heads, tile_d, 1), F32),        # l
                    pltpu.VMEM((tile_d, out_ch), F32)]          # acc

    kernel = partial(_hgt_attn_kernel, n_edges=n_edges, heads=heads,
                     head_dim=head_dim, use_skip=use_skip, apply_relu=apply_relu)

    out = pl.pallas_call(
        kernel,
        out_shape=jax.ShapeDtypeStruct((n_pad, out_ch), F32),
        grid=grid,
        in_specs=in_specs,
        out_specs=pl.BlockSpec((tile_d, out_ch), lambda i, j: (i, 0)),
        scratch_shapes=scratch,
        compiler_params=pltpu.CompilerParams(
            dimension_semantics=("parallel", "arbitrary"),
            vmem_limit_bytes=32 * 1024 * 1024),
    )(*args)
    return out[:n_dst]


# --------------------------------------------------------------------------- #
# Parameter init + (exact) weight folding + model glue                         #
# --------------------------------------------------------------------------- #
def _glorot(key, shape):
    fan_in, fan_out = shape[-2], shape[-1]
    bound = math.sqrt(6.0 / (fan_in + fan_out))
    return jax.random.uniform(key, shape, F32, -bound, bound)


def init_hgt_conv(key, node_types, edge_types, in_ch, out_ch, heads):
    head_dim = out_ch // heads
    p = {'k': {}, 'q': {}, 'v': {}, 'a_lin': {}, 'skip': {},
         'a_rel': {}, 'm_rel': {}, 'p_rel': {}}
    for nt in node_types:
        key, k1, k2, k3, k4 = jax.random.split(key, 5)
        p['k'][nt] = (_glorot(k1, (in_ch, out_ch)), jnp.zeros((out_ch,), F32))
        p['q'][nt] = (_glorot(k2, (in_ch, out_ch)), jnp.zeros((out_ch,), F32))
        p['v'][nt] = (_glorot(k3, (in_ch, out_ch)), jnp.zeros((out_ch,), F32))
        p['a_lin'][nt] = (_glorot(k4, (out_ch, out_ch)), jnp.zeros((out_ch,), F32))
        p['skip'][nt] = jnp.ones((1,), F32)
    for et in edge_types:
        key, k1, k2 = jax.random.split(key, 3)
        p['a_rel'][et] = _glorot(k1, (heads, head_dim, head_dim))
        p['m_rel'][et] = _glorot(k2, (heads, head_dim, head_dim))
        p['p_rel'][et] = jnp.ones((heads,), F32)
    return p, key


def _fold_rel(w, b, rel, heads, head_dim, head_scale=None):
    """Fold per-head linear relation transform `rel` (and optional per-head scale)
    into the projection weight/bias.  Exact: (x@W + b) @ rel == x@(W@rel) + b@rel."""
    in_ch, out_ch = w.shape
    if head_scale is not None:
        rel = rel * head_scale[:, None, None]
    w3 = w.reshape(in_ch, heads, head_dim)
    b2 = b.reshape(heads, head_dim)
    wf = jnp.einsum('ihd,hde->ihe', w3, rel).reshape(in_ch, out_ch)
    bf = jnp.einsum('hd,hde->he', b2, rel).reshape(out_ch)
    return wf, bf


def build_plan(node_counts, edge_types):
    incoming = {nt: [] for nt in node_counts}
    for et in edge_types:
        s, _, d = et
        if s in node_counts and d in node_counts:
            incoming[d].append(et)
    plan = {'incoming': incoming, 'dst': {}}
    for nt, n in node_counts.items():
        tile_d, n_pad = _dst_tiling(n)
        max_ns = max([node_counts[et[0]] for et in incoming[nt]], default=0)
        src_block, ns_pad = _src_tiling(max_ns)
        plan['dst'][nt] = dict(tile_d=tile_d, n_pad=n_pad,
                               src_block=src_block, ns_pad=ns_pad)
    return plan


def build_bias(edge_index_dict, node_counts, plan):
    """Dense additive mask per edge type, padded + sink column folded in (bf16)."""
    bias = {}
    for et, ei in edge_index_dict.items():
        s, _, d = et
        nd, ns = node_counts[d], node_counts[s]
        p = plan['dst'][d]
        adj = jnp.zeros((nd, ns), F32).at[ei[1], ei[0]].set(1.0)
        has_edge = jnp.sum(adj, axis=-1) > 0
        b = jnp.full((p['n_pad'], p['ns_pad']), MASK, F32)
        b = b.at[:nd, :ns].set(jnp.where(adj > 0, 0.0, MASK))
        # sink column (index ns): open only for rows with no in-edges of this edge type
        sink = jnp.where(has_edge, MASK, 0.0)
        sink_full = jnp.concatenate([sink, jnp.zeros((p['n_pad'] - nd,), F32)])
        b = b.at[:, ns].set(sink_full)
        bias[et] = b.astype(BF16)
    return bias


def hgt_conv_apply(params, x_dict, bias_dict, plan, heads, apply_relu):
    any_nt = next(iter(params['q']))
    out_ch = params['q'][any_nt][0].shape[1]
    head_dim = out_ch // heads

    out = {}
    for nt, x in x_dict.items():
        ets = [et for et in plan['incoming'][nt]
               if et[0] in x_dict and et in bias_dict]
        if not ets:                        # PyG behaviour: no incoming messages -> None
            out[nt] = None
            continue
        p = plan['dst'][nt]
        wq, bq = params['q'][nt]
        wlin, blin = params['a_lin'][nt]
        use_skip = (wlin.shape[1] == x.shape[-1])
        alpha = jax.nn.sigmoid(params['skip'][nt])

        edge_kvb = []
        for et in ets:
            src = et[0]
            wk, bk = params['k'][src]
            wv, bv = params['v'][src]
            k_scale = params['p_rel'][et] / math.sqrt(head_dim)
            wkf, bkf = _fold_rel(wk, bk, params['a_rel'][et], heads, head_dim, k_scale)
            wvf, bvf = _fold_rel(wv, bv, params['m_rel'][et], heads, head_dim, None)
            # hoisted: K/V computed once per (layer, edge type), bf16 in HBM
            k_e, v_e = kv_project(x_dict[src], wkf, bkf, wvf, bvf,
                                  ns_pad=p['ns_pad'], src_block=p['src_block'])
            edge_kvb.append((k_e, v_e, bias_dict[et]))

        out[nt] = hgt_dst_attention(x, wq, bq, wlin, blin, alpha, edge_kvb,
                                    heads=heads, head_dim=head_dim,
                                    use_skip=use_skip, apply_relu=apply_relu,
                                    tile_d=p['tile_d'], n_pad=p['n_pad'],
                                    src_block=p['src_block'], ns_pad=p['ns_pad'])
    return out


def hgt_model_apply(params, x_dict, edge_index_dict, node_counts, heads):
    plan = build_plan(node_counts, list(edge_index_dict.keys()))
    bias_dict = build_bias(edge_index_dict, node_counts, plan)   # built once, reused
    h = hgt_conv_apply(params['conv1'], x_dict, bias_dict, plan, heads, apply_relu=True)
    h = {k: v for k, v in h.items() if v is not None}
    out = hgt_conv_apply(params['conv2'], h, bias_dict, plan, heads, apply_relu=False)
    return out


# --------------------------------------------------------------------------- #
# Demo                                                                          #
# --------------------------------------------------------------------------- #
if __name__ == "__main__":
    key = jax.random.PRNGKey(0)

    node_types = ['author', 'paper']
    edge_types = [('author', 'writes', 'paper'),
                  ('paper', 'written_by', 'author'),
                  ('paper', 'cites', 'paper')]
    node_counts = {'author': 8, 'paper': 16}

    # lane-dense, 128-aligned channel sizes (head_dim = 128 for both layers);
    # the PyTorch default out_channels=300 is not 128-aligned, so the demo uses 256.
    IN_CH, HIDDEN, OUT, HEADS = 128, 256, 256, 2

    key, ka, kp = jax.random.split(key, 3)
    x_dict = {
        'author': jax.random.normal(ka, (node_counts['author'], IN_CH), F32),
        'paper':  jax.random.normal(kp, (node_counts['paper'], IN_CH), F32),
    }

    # unique (src, dst) edges per edge type -> dense-mask attention is exact
    def make_edges(k, n_src, n_dst, n_e):
        flat = jax.random.choice(k, n_src * n_dst, shape=(n_e,), replace=False)
        return jnp.stack([flat % n_src, flat // n_src]).astype(jnp.int32)  # [2, E]

    key, k1, k2, k3 = jax.random.split(key, 4)
    edge_index_dict = {
        ('author', 'writes', 'paper'):     make_edges(k1, 8, 16, 24),
        ('paper', 'written_by', 'author'): make_edges(k2, 16, 8, 20),
        ('paper', 'cites', 'paper'):       make_edges(k3, 16, 16, 32),
    }

    conv1, key = init_hgt_conv(key, node_types, edge_types, IN_CH, HIDDEN, HEADS)
    conv2, key = init_hgt_conv(key, node_types, edge_types, HIDDEN, OUT, HEADS)
    params = {'conv1': conv1, 'conv2': conv2}

    out = hgt_model_apply(params, x_dict, edge_index_dict, node_counts, HEADS)
    for v in out.values():
        jax.block_until_ready(v)

    assert out['author'].shape == (8, OUT) and out['paper'].shape == (16, OUT)
    assert all(bool(jnp.all(jnp.isfinite(v))) for v in out.values())
    print("KERNEL_OK")
</pallas_src>

<mosaic_0001>
module attributes {stable_mosaic.version = 11 : i64} {
  func.func @_kv_proj_kernel(%arg0: i32, %arg1: memref<128x128xbf16, #tpu.memory_space<vmem>>, %arg2: memref<128x256xbf16, #tpu.memory_space<vmem>>, %arg3: memref<1x256xf32, #tpu.memory_space<vmem>>, %arg4: memref<128x256xbf16, #tpu.memory_space<vmem>>, %arg5: memref<1x256xf32, #tpu.memory_space<vmem>>, %arg6: memref<128x256xbf16, #tpu.memory_space<vmem>>, %arg7: memref<128x256xbf16, #tpu.memory_space<vmem>>) attributes {dimension_semantics = [#tpu.dimension_semantics<parallel>], iteration_bounds = array<i64: 1>, scalar_prefetch = 0 : i64, scratch_operands = 0 : i64, tpu.core_type = #tpu.core_type<tc>, window_params = [{transform_indices = @transform_0, window_bounds = array<i64: 128, 128>}, {pipeline_mode = #tpu.pipeline_mode<synchronous>, transform_indices = @transform_1, window_bounds = array<i64: 128, 256>}, {pipeline_mode = #tpu.pipeline_mode<synchronous>, transform_indices = @transform_2, window_bounds = array<i64: 1, 256>}, {pipeline_mode = #tpu.pipeline_mode<synchronous>, transform_indices = @transform_3, window_bounds = array<i64: 128, 256>}, {pipeline_mode = #tpu.pipeline_mode<synchronous>, transform_indices = @transform_4, window_bounds = array<i64: 1, 256>}, {transform_indices = @transform_5, window_bounds = array<i64: 128, 256>}, {transform_indices = @transform_6, window_bounds = array<i64: 128, 256>}]} {
    %c0 = arith.constant 0 : index
    %c0_0 = arith.constant 0 : index
    %0 = vector.load %arg1[%c0, %c0_0] : memref<128x128xbf16, #tpu.memory_space<vmem>>, vector<128x128xbf16>
    %c0_1 = arith.constant 0 : index
    %c0_2 = arith.constant 0 : index
    %1 = vector.load %arg2[%c0_1, %c0_2] : memref<128x256xbf16, #tpu.memory_space<vmem>>, vector<128x256xbf16>
    %cst = arith.constant dense<0.000000e+00> : vector<128x256xf32>
    %2 = tpu.matmul %0, %1, %cst {dimension_numbers = #tpu.dot_dimension_numbers<[1], [0], [0], [1], [0, 0, 1, 1], [], []>} : vector<128x128xbf16>, vector<128x256xbf16>, vector<128x256xf32> -> vector<128x256xf32>
    %c0_3 = arith.constant 0 : index
    %c0_4 = arith.constant 0 : index
    %3 = vector.load %arg3[%c0_3, %c0_4] : memref<1x256xf32, #tpu.memory_space<vmem>>, vector<1x256xf32>
    %4 = vector.broadcast %3 : vector<1x256xf32> to vector<128x256xf32>
    %5 = arith.addf %2, %4 : vector<128x256xf32>
    %c0_5 = arith.constant 0 : index
    %c0_6 = arith.constant 0 : index
    %6 = vector.load %arg4[%c0_5, %c0_6] : memref<128x256xbf16, #tpu.memory_space<vmem>>, vector<128x256xbf16>
    %cst_7 = arith.constant dense<0.000000e+00> : vector<128x256xf32>
    %7 = tpu.matmul %0, %6, %cst_7 {dimension_numbers = #tpu.dot_dimension_numbers<[1], [0], [0], [1], [0, 0, 1, 1], [], []>} : vector<128x128xbf16>, vector<128x256xbf16>, vector<128x256xf32> -> vector<128x256xf32>
    %c0_8 = arith.constant 0 : index
    %c0_9 = arith.constant 0 : index
    %8 = vector.load %arg5[%c0_8, %c0_9] : memref<1x256xf32, #tpu.memory_space<vmem>>, vector<1x256xf32>
    %9 = vector.broadcast %8 : vector<1x256xf32> to vector<128x256xf32>
    %10 = arith.addf %7, %9 : vector<128x256xf32>
    %11 = tpu.iota {dimensions = array<i32: 0>} : vector<128x256xi32>
    %c128_i32 = arith.constant 128 : i32
    %12 = arith.muli %arg0, %c128_i32 : i32
    %13 = vector.broadcast %12 : i32 to vector<128x256xi32>
    %14 = arith.addi %11, %13 : vector<128x256xi32>
    %c16_i32 = arith.constant 16 : i32
    %15 = vector.broadcast %c16_i32 : i32 to vector<128x256xi32>
    %16 = arith.cmpi slt, %14, %15 : vector<128x256xi32>
    %cst_10 = arith.constant 0.000000e+00 : f32
    %17 = vector.broadcast %cst_10 : f32 to vector<128x256xf32>
    %18 = arith.select %16, %5, %17 : vector<128x256xi1>, vector<128x256xf32>
    %19 = arith.truncf %18 : vector<128x256xf32> to vector<128x256xbf16>
    %c0_11 = arith.constant 0 : index
    %c0_12 = arith.constant 0 : index
    %20 = vector.load %arg6[%c0_11, %c0_12] : memref<128x256xbf16, #tpu.memory_space<vmem>>, vector<128x256xbf16>
    tpu.vector_store %arg6[%c0_11, %c0_12], %19 {strides = array<i32>} : memref<128x256xbf16, #tpu.memory_space<vmem>>, vector<128x256xbf16>,
    %cst_13 = arith.constant 0.000000e+00 : f32
    %21 = vector.broadcast %cst_13 : f32 to vector<128x256xf32>
    %22 = arith.select %16, %10, %21 : vector<128x256xi1>, vector<128x256xf32>
    %23 = arith.truncf %22 : vector<128x256xf32> to vector<128x256xbf16>
    %c0_14 = arith.constant 0 : index
    %c0_15 = arith.constant 0 : index
    %24 = vector.load %arg7[%c0_14, %c0_15] : memref<128x256xbf16, #tpu.memory_space<vmem>>, vector<128x256xbf16>
    tpu.vector_store %arg7[%c0_14, %c0_15], %23 {strides = array<i32>} : memref<128x256xbf16, #tpu.memory_space<vmem>>, vector<128x256xbf16>,
    return
  }
  func.func @transform_0(%arg0: i32) -> (i32, i32) {
    %c0_i32 = arith.constant 0 : i32
    %c0_i32_0 = arith.constant 0 : i32
    return %arg0, %c0_i32 : i32, i32
  }
  func.func @transform_1(%arg0: i32) -> (i32, i32) {
    %c0_i32 = arith.constant 0 : i32
    %c0_i32_0 = arith.constant 0 : i32
    %c0_i32_1 = arith.constant 0 : i32
    return %c0_i32, %c0_i32_0 : i32, i32
  }
  func.func @transform_2(%arg0: i32) -> (i32, i32) {
    %c0_i32 = arith.constant 0 : i32
    %c0_i32_0 = arith.constant 0 : i32
    %c0_i32_1 = arith.constant 0 : i32
    return %c0_i32, %c0_i32_0 : i32, i32
  }
  func.func @transform_3(%arg0: i32) -> (i32, i32) {
    %c0_i32 = arith.constant 0 : i32
    %c0_i32_0 = arith.constant 0 : i32
    %c0_i32_1 = arith.constant 0 : i32
    return %c0_i32, %c0_i32_0 : i32, i32
  }
  func.func @transform_4(%arg0: i32) -> (i32, i32) {
    %c0_i32 = arith.constant 0 : i32
    %c0_i32_0 = arith.constant 0 : i32
    %c0_i32_1 = arith.constant 0 : i32
    return %c0_i32, %c0_i32_0 : i32, i32
  }
  func.func @transform_5(%arg0: i32) -> (i32, i32) {
    %c0_i32 = arith.constant 0 : i32
    %c0_i32_0 = arith.constant 0 : i32
    return %arg0, %c0_i32 : i32, i32
  }
  func.func @transform_6(%arg0: i32) -> (i32, i32) {
    %c0_i32 = arith.constant 0 : i32
    %c0_i32_0 = arith.constant 0 : i32
    return %arg0, %c0_i32 : i32, i32
  }
}

</mosaic_0001>

<bundles_post_ra>
// kernel: tpu_custom_call.1
= control target key start
LH: loop header
LB: loop body
LE: loop exit
PB: predicated region body
PF: predicated region fallthrough
CT: control target
= control target key end

     0   :  { %12 = vsyncpa [#allocation3], 0  ;;  %s1291_s0 = inlined_call_operand.hbm [shape: bf16[128,128], index: 0, kind: input, shape index: {}]   ;;  %s1292_s1 = inlined_call_operand.hbm [shape: bf16[128,256], index: 1, kind: input, shape index: {}]   ;;  %s1293_s2 = inlined_call_operand.vmem [shape: f32[1,256], index: 2, kind: input, shape index: {}]   ;;  %s1294_s3 = inlined_call_operand.hbm [shape: bf16[128,256], index: 3, kind: input, shape index: {}]   ;;  %s1295_s4 = inlined_call_operand.vmem [shape: f32[1,256], index: 4, kind: input, shape index: {}]   ;;  %s1296_s5 = inlined_call_operand.hbm [shape: bf16[128,256], index: 5, kind: output, shape index: {0}]   ;;  %s1297_s6 = inlined_call_operand.hbm [shape: bf16[128,256], index: 6, kind: output, shape index: {1}]  }
   0x1   :  { %13 = vsyncpa [#allocation6], 0 }
   0x2   :  { %14 = vsyncpa [#allocation4], 0 }
   0x3   :  { %15 = vsyncpa [#allocation10], 0  ;;  %s1196_s21 = smov [#allocation5]  }
   0x4   :  { %s33_s22 = sshll.u32 %s1196_s21, 4  ;;  %s34_s22 = int_to_ptr.vmem [resolvable:$true] %s33_s22 }
   0x5   :  { %s1096_s23 = scalar_lea.vmem %s34_s22, 2048  ;;  %p1101_p1 = scmp.lt.s32.totalorder %s34_s22, %s34_s22 }
   0x6   :  { %p1097_p0 = scmp.ne.s32.totalorder %s34_s22, %s1096_s23  ;;  %p1102_p2 = scmp.lt.s32.totalorder %s1096_s23, %s1096_s23 }
   0x8   :  { %p1103_p3 = por %p1102_p2, %p1101_p1 }
   0xa   :  { %p1104_p4 = pnand %p1103_p3, %p1097_p0 }
   0xc   :  { %1107 = shalt.err (!%p1104_p4)
}
   0xd   :  { %s1197_s24 = smov 128   ;;  %s1198_s25 = smov 8  }
   0xe   :  { %39 = dma.hbm_to_vmem [thread:$0]  %s1292_s1, 2048, %s34_s22, [#allocation6], %s1197_s24, %s1197_s24, %s1198_s25  }
   0xf   :  { %s1199_s28 = smov [#allocation2]  }
  0x10   :  { %s21_s29 = sshll.u32 %s1199_s28, 4  ;;  %s22_s29 = int_to_ptr.vmem [resolvable:$true] %s21_s29 }
  0x11   :  { %s1116_s30 = scalar_lea.vmem %s22_s29, 1024  ;;  %p1121_p6 = scmp.lt.s32.totalorder %s22_s29, %s22_s29 }
  0x12   :  { %p1117_p5 = scmp.ne.s32.totalorder %s22_s29, %s1116_s30  ;;  %p1122_p7 = scmp.lt.s32.totalorder %s1116_s30, %s1116_s30 }
  0x14   :  { %p1123_p8 = por %p1122_p7, %p1121_p6 }
  0x16   :  { %p1124_p9 = pnand %p1123_p8, %p1117_p5 }
  0x18   :  { %1127 = shalt.err (!%p1124_p9)
}
  0x19   :  { %s1200_s7 = smov 64   ;;  %s1201_s8 = smov 4  }
  0x1a   :  { %27 = dma.hbm_to_vmem [thread:$0]  %s1291_s0, 1024, %s22_s29, [#allocation3], %s1200_s7, %s1200_s7, %s1201_s8  }
  0x1b   :  { %s1202_s11 = smov [#allocation7]  }
  0x1c   :  { %s47_s12 = sshll.u32 %s1202_s11, 4  ;;  %s48_s12 = int_to_ptr.vmem [resolvable:$true] %s47_s12 }
  0x1d   :  { %s1136_s1 = scalar_lea.vmem %s48_s12, 2048  ;;  %p1141_p11 = scmp.lt.s32.totalorder %s48_s12, %s48_s12 }
  0x1e   :  { %p1137_p10 = scmp.ne.s32.totalorder %s48_s12, %s1136_s1  ;;  %p1142_p12 = scmp.lt.s32.totalorder %s1136_s1, %s1136_s1 }
  0x20   :  { %p1143_p13 = por %p1142_p12, %p1141_p11 }
  0x22   :  { %p1144_p0 = pnand %p1143_p13, %p1137_p10 }
  0x24   :  { %1147 = shalt.err (!%p1144_p0)
}
  0x25   :  { %53 = dma.hbm_to_vmem [thread:$0]  %s1294_s3, 2048, %s48_s12, [#allocation6], %s1197_s24, %s1197_s24, %s1198_s25  }
  0x26   :  { %1188 = dma.done.wait [#allocation3], 1024  }
  0x27   :  { %1189 = vsyncadd [#allocation3], 4294966272 }
  0x28   :  { %1190 = dma.done.wait [#allocation6], 4096  }
  0x29   :  { %1191 = vsyncadd [#allocation6], 4294963200  ;;  %v1203_v0 = vmov 0   ;;  %v1032_v1 = vld [vmem:[#allocation5 + $0x74] ss:$8 sps:$4 sm:$0xff]   ;;  %v1080_v33 = vld [vmem:[#allocation2] sm:$0xff]   ;;  %v100_v44 = vlaneseq }
  0x2a   :  { %270 = vmatprep.mubr.bf16.mxu0 %v1203_v0  ;;  %491 = vmatprep.mubr.bf16.mxu1 %v1203_v0  ;;  %v1034_v2 = vld [vmem:[#allocation7 + $0x74] ss:$8 sps:$4 sm:$0xff]   ;;  %v1036_v3 = vld [vmem:[#allocation5 + $0x70] ss:$8 sps:$4 sm:$0xff]   ;;  %v1038_v5 = vld [vmem:[#allocation5 + $0x64] ss:$8 sps:$4 sm:$0xff]  }
  0x2b   :  { %238 = vmatprep.subr.bf16.mxu0 %v1032_v1  ;;  %v1037_v4 = vld [vmem:[#allocation7 + $0x70] ss:$8 sps:$4 sm:$0xff]   ;;  %459 = vmatprep.subr.bf16.mxu1 %v1034_v2  ;;  %v1040_v6 = vld [vmem:[#allocation7 + $0x64] ss:$8 sps:$4 sm:$0xff]   ;;  %v1042_v7 = vld [vmem:[#allocation5 + $0x60] ss:$8 sps:$4 sm:$0xff]  }
  0x2c   :  { %239 = vmatpush1.bf16.msra.mxu0 %v1036_v3  ;;  %460 = vmatpush1.bf16.msra.mxu1 %v1037_v4  ;;  %v1043_v8 = vld [vmem:[#allocation7 + $0x60] ss:$8 sps:$4 sm:$0xff]   ;;  %v1044_v9 = vld [vmem:[#allocation5 + $0x54] ss:$8 sps:$4 sm:$0xff]   ;;  %v1048_v11 = vld [vmem:[#allocation5 + $0x50] ss:$8 sps:$4 sm:$0xff]  }
  0x2d   :  { %240 = vmatprep.subr.bf16.mxu0 %v1038_v5  ;;  %461 = vmatprep.subr.bf16.mxu1 %v1040_v6  ;;  %v1046_v10 = vld [vmem:[#allocation7 + $0x54] ss:$8 sps:$4 sm:$0xff]   ;;  %v1049_v12 = vld [vmem:[#allocation7 + $0x50] ss:$8 sps:$4 sm:$0xff]   ;;  %v1050_v13 = vld [vmem:[#allocation5 + $0x44] ss:$8 sps:$4 sm:$0xff]  }
  0x2e   :  { %v1052_v14 = vld [vmem:[#allocation7 + $0x44] ss:$8 sps:$4 sm:$0xff]   ;;  %v1054_v15 = vld [vmem:[#allocation5 + $0x40] ss:$8 sps:$4 sm:$0xff]   ;;  %v1056_v17 = vld [vmem:[#allocation5 + $0x34] ss:$8 sps:$4 sm:$0xff]  }
  0x2f   :  { %v1055_v16 = vld [vmem:[#allocation7 + $0x40] ss:$8 sps:$4 sm:$0xff]   ;;  %v1058_v18 = vld [vmem:[#allocation7 + $0x34] ss:$8 sps:$4 sm:$0xff]   ;;  %v1060_v19 = vld [vmem:[#allocation5 + $0x30] ss:$8 sps:$4 sm:$0xff]  }
  0x30   :  { %241 = vmatpush1.bf16.msra.mxu0 %v1042_v7  ;;  %462 = vmatpush1.bf16.msra.mxu1 %v1043_v8  ;;  %v1061_v20 = vld [vmem:[#allocation7 + $0x30] ss:$8 sps:$4 sm:$0xff]   ;;  %v1062_v21 = vld [vmem:[#allocation5 + $0x24] ss:$8 sps:$4 sm:$0xff]   ;;  %v1066_v23 = vld [vmem:[#allocation5 + $0x20] ss:$8 sps:$4 sm:$0xff]  }
  0x31   :  { %242 = vmatprep.subr.bf16.mxu0 %v1044_v9  ;;  %463 = vmatprep.subr.bf16.mxu1 %v1046_v10  ;;  %v1064_v22 = vld [vmem:[#allocation7 + $0x24] ss:$8 sps:$4 sm:$0xff]   ;;  %v1067_v24 = vld [vmem:[#allocation7 + $0x20] ss:$8 sps:$4 sm:$0xff]   ;;  %v1068_v25 = vld [vmem:[#allocation5 + $0x14] ss:$8 sps:$4 sm:$0xff]  }
  0x32   :  { %v1070_v26 = vld [vmem:[#allocation7 + $0x14] ss:$8 sps:$4 sm:$0xff]   ;;  %v1072_v27 = vld [vmem:[#allocation5 + $0x10] ss:$8 sps:$4 sm:$0xff]   ;;  %v1074_v29 = vld [vmem:[#allocation5 + $0x4] ss:$8 sps:$4 sm:$0xff]  }
  0x33   :  { %v1073_v28 = vld [vmem:[#allocation7 + $0x10] ss:$8 sps:$4 sm:$0xff]   ;;  %v1076_v30 = vld [vmem:[#allocation7 + $0x4] ss:$8 sps:$4 sm:$0xff]   ;;  %v1078_v31 = vld [vmem:[#allocation5] ss:$8 sps:$4 sm:$0xff]  }
  0x34   :  { %243 = vmatpush1.bf16.msra.mxu0 %v1048_v11  ;;  %464 = vmatpush1.bf16.msra.mxu1 %v1049_v12  ;;  %v1079_v32 = vld [vmem:[#allocation7] ss:$8 sps:$4 sm:$0xff]   ;;  %v1082_v35 = vld [vmem:[#allocation2 + $0x10] sm:$0xff]   ;;  %v1083_v36 = vld [vmem:[#allocation2 + $0x18] sm:$0xff]   ;;  %v1204_v41 = vmov 0.0|0.0   ;;  %v101_v45 = vshrl.u32 %v100_v44, 7 }
  0x35   :  { %244 = vmatprep.subr.bf16.mxu0 %v1050_v13  ;;  %465 = vmatprep.subr.bf16.mxu1 %v1052_v14  ;;  %v1081_v34 = vld [vmem:[#allocation2 + $0x8] sm:$0xff]   ;;  %v1084_v37 = vld [vmem:[#allocation2 + $0x20] sm:$0xff]   ;;  %v1086_v39 = vld [vmem:[#allocation2 + $0x30] sm:$0xff]   ;;  %v987_v42 = vcombine.low %v1204_v41, %v1204_v41  ;;  %v988_v43 = vcombine.high %v1204_v41, %v1204_v41  ;;  %s1206_s17 = smov [#allocation9]  }
  0x36   :  { %v1085_v38 = vld [vmem:[#allocation2 + $0x28] sm:$0xff]   ;;  %v1087_v40 = vld [vmem:[#allocation2 + $0x38] sm:$0xff]   ;;  %v102_v46 = vsub.s32 0, %v101_v45  ;;  %v106_v47 = vsub.s32 1, %v101_v45  ;;  %v98_v48 = vld [vmem:[%s1293_s2] sm:$0x3] }
  0x37   :  { %753 = vst [vmem:[#allocation8 + $0x10] sm:$0xff] %v987_v42  ;;  %754 = vst [vmem:[#allocation8 + $0x18] sm:$0xff] %v988_v43  ;;  %v367_v49 = vld [vmem:[%s1295_s4] sm:$0x3]  ;;  %s1205_s2 = smov [#allocation8]   ;;  %s928_s18 = sshll.u32 %s1206_s17, 4  ;;  %s929_s18 = int_to_ptr.vmem [resolvable:$true] %s928_s18 }
  0x38   :  { %245 = vmatpush1.bf16.msra.mxu0 %v1054_v15  ;;  %466 = vmatpush1.bf16.msra.mxu1 %v1055_v16  ;;  %755 = vst [vmem:[#allocation8 + $0x20] sm:$0xff] %v987_v42  ;;  %756 = vst [vmem:[#allocation8 + $0x28] sm:$0xff] %v988_v43  ;;  %v103_v50 = vrot.slane %v98_v48, %v102_v46  ;;  %v372_v51 = vrot.slane %v367_v49, %v102_v46  ;;  %s916_s4 = sshll.u32 %s1205_s2, 4  ;;  %s917_s4 = int_to_ptr.vmem [resolvable:$true] %s916_s4 }
  0x39   :  { %246 = vmatprep.subr.bf16.mxu0 %v1056_v17  ;;  %467 = vmatprep.subr.bf16.mxu1 %v1058_v18  ;;  %757 = vst [vmem:[#allocation8 + $0x30] sm:$0xff] %v987_v42  ;;  %758 = vst [vmem:[#allocation8 + $0x38] sm:$0xff] %v988_v43  ;;  %v107_v52 = vrot.slane %v98_v48, %v106_v47  ;;  %v376_v53 = vrot.slane %v367_v49, %v106_v47  ;;  %s1148_s19 = scalar_lea.vmem %s917_s4, 2048  ;;  %p1153_p2 = scmp.lt.s32.totalorder %s917_s4, %s917_s4 }
  0x3a   :  { %759 = vst [vmem:[#allocation8 + $0x40] sm:$0xff] %v987_v42  ;;  %760 = vst [vmem:[#allocation8 + $0x48] sm:$0xff] %v988_v43  ;;  %p1149_p1 = scmp.ne.s32.totalorder %s917_s4, %s1148_s19  ;;  %p1154_p3 = scmp.lt.s32.totalorder %s1148_s19, %s1148_s19 }
  0x3b   :  { %761 = vst [vmem:[#allocation8 + $0x50] sm:$0xff] %v987_v42  ;;  %762 = vst [vmem:[#allocation8 + $0x58] sm:$0xff] %v988_v43 }
  0x3c   :  { %247 = vmatpush1.bf16.msra.mxu0 %v1060_v19  ;;  %468 = vmatpush1.bf16.msra.mxu1 %v1061_v20  ;;  %763 = vst [vmem:[#allocation8 + $0x60] sm:$0xff] %v987_v42  ;;  %764 = vst [vmem:[#allocation8 + $0x68] sm:$0xff] %v988_v43  ;;  %p1155_p4 = por %p1154_p3, %p1153_p2 }
  0x3d   :  { %248 = vmatprep.subr.bf16.mxu0 %v1062_v21  ;;  %469 = vmatprep.subr.bf16.mxu1 %v1064_v22  ;;  %765 = vst [vmem:[#allocation8 + $0x70] sm:$0xff] %v987_v42  ;;  %766 = vst [vmem:[#allocation8 + $0x78] sm:$0xff] %v988_v43 }
  0x3e   :  { %897 = vst [vmem:[#allocation9 + $0x10] sm:$0xff] %v987_v42  ;;  %898 = vst [vmem:[#allocation9 + $0x18] sm:$0xff] %v988_v43  ;;  %p1156_p5 = pnand %p1155_p4, %p1149_p1 }
  0x3f   :  { %899 = vst [vmem:[#allocation9 + $0x20] sm:$0xff] %v987_v42  ;;  %900 = vst [vmem:[#allocation9 + $0x28] sm:$0xff] %v988_v43 }
  0x40   :  { %249 = vmatpush1.bf16.msra.mxu0 %v1066_v23  ;;  %470 = vmatpush1.bf16.msra.mxu1 %v1067_v24  ;;  %901 = vst [vmem:[#allocation9 + $0x30] sm:$0xff] %v987_v42  ;;  %902 = vst [vmem:[#allocation9 + $0x38] sm:$0xff] %v988_v43 }
  0x41   :  { %250 = vmatprep.subr.bf16.mxu0 %v1068_v25  ;;  %471 = vmatprep.subr.bf16.mxu1 %v1070_v26  ;;  %903 = vst [vmem:[#allocation9 + $0x40] sm:$0xff] %v987_v42  ;;  %904 = vst [vmem:[#allocation9 + $0x48] sm:$0xff] %v988_v43 }
  0x42   :  { %905 = vst [vmem:[#allocation9 + $0x50] sm:$0xff] %v987_v42  ;;  %906 = vst [vmem:[#allocation9 + $0x58] sm:$0xff] %v988_v43 }
  0x43   :  { %907 = vst [vmem:[#allocation9 + $0x60] sm:$0xff] %v987_v42  ;;  %908 = vst [vmem:[#allocation9 + $0x68] sm:$0xff] %v988_v43 }
  0x44   :  { %251 = vmatpush1.bf16.msra.mxu0 %v1072_v27  ;;  %472 = vmatpush1.bf16.msra.mxu1 %v1073_v28  ;;  %909 = vst [vmem:[#allocation9 + $0x70] sm:$0xff] %v987_v42  ;;  %910 = vst [vmem:[#allocation9 + $0x78] sm:$0xff] %v988_v43 }
  0x45   :  { %252 = vmatprep.subr.bf16.mxu0 %v1074_v29  ;;  %473 = vmatprep.subr.bf16.mxu1 %v1076_v30 }
  0x48   :  { %253 = vmatpush1.bf16.msra.mxu0 %v1078_v31  ;;  %474 = vmatpush1.bf16.msra.mxu1 %v1079_v32 }
  0x4b   :  { %271 = vmatmul.mubr.bf16.vlgmr.msra.gmra.mxu0 %v1080_v33  ;;  %492 = vmatmul.mubr.bf16.vlgmr.msra.gmra.mxu1 %v1080_v33 }
  0x4c   :  { %280 = vmatprep.mubr.bf16.mxu0 %v1203_v0  ;;  %501 = vmatprep.mubr.bf16.mxu1 %v1203_v0 }
  0x53   :  { %281 = vmatmul.mubr.bf16.gmra.mxu0 %v1081_v34  ;;  %502 = vmatmul.mubr.bf16.gmra.mxu1 %v1081_v34 }
  0x54   :  { %290 = vmatprep.mubr.bf16.mxu0 %v1203_v0  ;;  %511 = vmatprep.mubr.bf16.mxu1 %v1203_v0 }
  0x5b   :  { %291 = vmatmul.mubr.bf16.gmra.mxu0 %v1082_v35  ;;  %512 = vmatmul.mubr.bf16.gmra.mxu1 %v1082_v35 }
  0x5c   :  { %300 = vmatprep.mubr.bf16.mxu0 %v1203_v0  ;;  %521 = vmatprep.mubr.bf16.mxu1 %v1203_v0 }
  0x63   :  { %301 = vmatmul.mubr.bf16.gmra.mxu0 %v1083_v36  ;;  %522 = vmatmul.mubr.bf16.gmra.mxu1 %v1083_v36 }
  0x64   :  { %310 = vmatprep.mubr.bf16.mxu0 %v1203_v0  ;;  %531 = vmatprep.mubr.bf16.mxu1 %v1203_v0 }
  0x6b   :  { %311 = vmatmul.mubr.bf16.gmra.mxu0 %v1084_v37  ;;  %532 = vmatmul.mubr.bf16.gmra.mxu1 %v1084_v37 }
  0x6c   :  { %320 = vmatprep.mubr.bf16.mxu0 %v1203_v0  ;;  %541 = vmatprep.mubr.bf16.mxu1 %v1203_v0 }
  0x73   :  { %321 = vmatmul.mubr.bf16.gmra.mxu0 %v1085_v38  ;;  %542 = vmatmul.mubr.bf16.gmra.mxu1 %v1085_v38 }
  0x74   :  { %330 = vmatprep.mubr.bf16.mxu0 %v1203_v0  ;;  %551 = vmatprep.mubr.bf16.mxu1 %v1203_v0 }
  0x7b   :  { %331 = vmatmul.mubr.bf16.gmra.mxu0 %v1086_v39  ;;  %552 = vmatmul.mubr.bf16.gmra.mxu1 %v1086_v39 }
  0x7c   :  { %340 = vmatprep.mubr.bf16.mxu0 %v1203_v0  ;;  %561 = vmatprep.mubr.bf16.mxu1 %v1203_v0 }
  0x83   :  { %341 = vmatmul.mubr.bf16.gmra.mxu0 %v1087_v40  ;;  %562 = vmatmul.mubr.bf16.gmra.mxu1 %v1087_v40 }
 0x10b   :  { %v272_v54 = vpop.f32.mrf.mxu0  ;;  %v493_v55 = vpop.f32.mrf.mxu1 }
 0x10c   :  { %v273_v58 = vadd.f32 %v272_v54, %v103_v50  ;;  %v494_v59 = vadd.f32 %v493_v55, %v372_v51 }
 0x10d   :  { %v274_v56 = vpop.f32.mrf.mxu0  ;;  %v495_v57 = vpop.f32.mrf.mxu1 }
 0x10e   :  { %v275_v60 = vadd.f32 %v274_v56, %v107_v52  ;;  %v496_v61 = vadd.f32 %v495_v57, %v376_v53 }
 0x10f   :  { %v276_v62 = vpop.f32.mrf.mxu0  ;;  %v497_v63 = vpop.f32.mrf.mxu1 }
 0x110   :  { %v1017_v0 = vpack.c.bf16 %v275_v60, %v273_v58  ;;  %v1019_v1 = vpack.c.bf16 %v496_v61, %v494_v59  ;;  %v277_v4 = vadd.f32 %v276_v62, %v103_v50  ;;  %v498_v5 = vadd.f32 %v497_v63, %v372_v51 }
 0x111   :  { %v278_v2 = vpop.f32.mrf.mxu0  ;;  %v499_v3 = vpop.f32.mrf.mxu1 }
 0x112   :  { %751 = vst [vmem:[#allocation8] sm:$0xff] %v1017_v0  ;;  %895 = vst [vmem:[#allocation9] sm:$0xff] %v1019_v1  ;;  %v279_v6 = vadd.f32 %v278_v2, %v107_v52  ;;  %v500_v7 = vadd.f32 %v499_v3, %v376_v53 }
 0x113   :  { %v282_v8 = vpop.f32.mrf.mxu0  ;;  %v503_v9 = vpop.f32.mrf.mxu1 }
 0x114   :  { %v1018_v10 = vpack.c.bf16 %v279_v6, %v277_v4  ;;  %v1020_v11 = vpack.c.bf16 %v500_v7, %v498_v5 }
 0x115   :  { %v284_v12 = vpop.f32.mrf.mxu0  ;;  %v505_v13 = vpop.f32.mrf.mxu1 }
 0x116   :  { %752 = vst [vmem:[#allocation8 + $0x8] sm:$0xff] %v1018_v10  ;;  %896 = vst [vmem:[#allocation9 + $0x8] sm:$0xff] %v1020_v11 }
 0x117   :  { %v286_v14 = vpop.f32.mrf.mxu0  ;;  %v507_v15 = vpop.f32.mrf.mxu1 }
 0x118   :  { %1159 = shalt.err (!%p1156_p5)
}
 0x119   :  { %922 = dma.vmem_to_hbm [thread:$0]  %s917_s4, 2048, %s1296_s5, [#allocation4], %s1197_s24, %s1197_s24, %s1198_s25  }
 0x11a   :  { %s1168_s22 = scalar_lea.vmem %s929_s18, 2048  ;;  %p1173_p7 = scmp.lt.s32.totalorder %s929_s18, %s929_s18 }
 0x11b   :  { %p1169_p6 = scmp.ne.s32.totalorder %s929_s18, %s1168_s22  ;;  %p1174_p8 = scmp.lt.s32.totalorder %s1168_s22, %s1168_s22 }
 0x11d   :  { %p1175_p9 = por %p1174_p8, %p1173_p7 }
 0x11f   :  { %p1176_p10 = pnand %p1175_p9, %p1169_p6 }
 0x121   :  { %1179 = shalt.err (!%p1176_p10)
}
 0x122   :  { %934 = dma.vmem_to_hbm [thread:$0]  %s929_s18, 2048, %s1297_s6, [#allocation10], %s1197_s24, %s1197_s24, %s1198_s25   ;;  %v288_v16 = vpop.f32.mrf.mxu0  ;;  %v509_v17 = vpop.f32.mrf.mxu1 }
 0x124   :  { %v292_v18 = vpop.f32.mrf.mxu0  ;;  %v513_v19 = vpop.f32.mrf.mxu1 }
 0x126   :  { %v294_v20 = vpop.f32.mrf.mxu0  ;;  %v515_v21 = vpop.f32.mrf.mxu1 }
 0x128   :  { %v296_v22 = vpop.f32.mrf.mxu0  ;;  %v517_v23 = vpop.f32.mrf.mxu1 }
 0x12a   :  { %v298_v24 = vpop.f32.mrf.mxu0  ;;  %v519_v25 = vpop.f32.mrf.mxu1 }
 0x12c   :  { %v302_v26 = vpop.f32.mrf.mxu0  ;;  %v523_v27 = vpop.f32.mrf.mxu1 }
 0x12e   :  { %v304_v28 = vpop.f32.mrf.mxu0  ;;  %v525_v29 = vpop.f32.mrf.mxu1 }
 0x130   :  { %v306_v30 = vpop.f32.mrf.mxu0  ;;  %v527_v31 = vpop.f32.mrf.mxu1 }
 0x132   :  { %v308_v32 = vpop.f32.mrf.mxu0  ;;  %v529_v33 = vpop.f32.mrf.mxu1 }
 0x134   :  { %v312_v34 = vpop.f32.mrf.mxu0  ;;  %v533_v35 = vpop.f32.mrf.mxu1 }
 0x136   :  { %v314_v36 = vpop.f32.mrf.mxu0  ;;  %v535_v37 = vpop.f32.mrf.mxu1 }
 0x138   :  { %v316_v38 = vpop.f32.mrf.mxu0  ;;  %v537_v39 = vpop.f32.mrf.mxu1 }
 0x13a   :  { %v318_v40 = vpop.f32.mrf.mxu0  ;;  %v539_v41 = vpop.f32.mrf.mxu1 }
 0x13c   :  { %v322_v42 = vpop.f32.mrf.mxu0  ;;  %v543_v43 = vpop.f32.mrf.mxu1 }
 0x13e   :  { %v324_v44 = vpop.f32.mrf.mxu0  ;;  %v545_v45 = vpop.f32.mrf.mxu1 }
 0x140   :  { %v326_v46 = vpop.f32.mrf.mxu0  ;;  %v547_v47 = vpop.f32.mrf.mxu1 }
 0x142   :  { %v328_v48 = vpop.f32.mrf.mxu0  ;;  %v549_v49 = vpop.f32.mrf.mxu1 }
 0x144   :  { %v332_v50 = vpop.f32.mrf.mxu0  ;;  %v553_v51 = vpop.f32.mrf.mxu1 }
 0x146   :  { %v334_v52 = vpop.f32.mrf.mxu0  ;;  %v555_v53 = vpop.f32.mrf.mxu1 }
 0x148   :  { %v336_v54 = vpop.f32.mrf.mxu0  ;;  %v557_v55 = vpop.f32.mrf.mxu1 }
 0x14a   :  { %v338_v56 = vpop.f32.mrf.mxu0  ;;  %v559_v57 = vpop.f32.mrf.mxu1 }
 0x14c   :  { %v342_v58 = vpop.f32.mrf.mxu0  ;;  %v563_v59 = vpop.f32.mrf.mxu1 }
 0x14e   :  { %v344_v60 = vpop.f32.mrf.mxu0  ;;  %v565_v61 = vpop.f32.mrf.mxu1 }
 0x150   :  { %v346_v62 = vpop.f32.mrf.mxu0  ;;  %v567_v63 = vpop.f32.mrf.mxu1 }
 0x152   :  { %v348_v0 = vpop.f32.mrf.mxu0  ;;  %v569_v1 = vpop.f32.mrf.mxu1 }
 0x153   :  { %1192 = dma.done.wait [#allocation4], 2048  }
 0x154   :  { %1193 = vsyncadd [#allocation4], 4294965248 }
 0x155   :  { %1194 = dma.done.wait [#allocation10], 2048  }
 0x156   :  { %1195 = vsyncadd [#allocation10], 4294965248 }
 0x157   :  { %941 = vsyncpa [#allocation3], 1 }
 0x158   :  { %942 = vsyncpa [#allocation6], 1 }
 0x159   :  { %943 = vsyncpa [#allocation4], 1 }
 0x15a   :  { %944 = vsyncpa [#allocation10], 1 }

</bundles_post_ra>
